<compile_context>
chip_gen: v7x
topology: tpu7x:2x2x1
jax: 0.10.0
libtpu: 0.0.40
codegen_flags: <defaults>
</compile_context>

<pallas_src>
import functools

import jax
import jax.numpy as jnp
from jax.experimental import pallas as pl
from jax.experimental.pallas import tpu as pltpu


_TARGET_TILE_BYTES = 4 << 20  # ~4 MiB input tile -> ~8 MiB double-buffered


def _min_value(dtype):
    dtype = jnp.dtype(dtype)
    if jnp.issubdtype(dtype, jnp.floating):
        return jnp.array(-jnp.inf, dtype=dtype)
    return jnp.array(jnp.iinfo(dtype).min, dtype=dtype)


def _choose_tiles(rows, length, itemsize):
    """Pick (TM, TL) row/lane tile sizes under the VMEM budget."""
    budget_elems = max(_TARGET_TILE_BYTES // itemsize, 8 * 128)
    sublane_mult = 8 * max(1, 4 // itemsize)  # 8 (f32) / 16 (bf16) / 32 (int8)

    # Reduction-axis (lane) tile: keep full L in one block when it fits with at
    # least one sublane group of rows; otherwise a multiple of 128.
    if length * sublane_mult <= budget_elems:
        tl = length
    else:
        tl = max(128, (budget_elems // (sublane_mult * 128)) * 128)

    # Row (sublane) tile: full rows if small, else a multiple of the sublane
    # packing granularity, capped by the budget.
    tm_cap = max(budget_elems // tl, sublane_mult)
    if rows <= tm_cap:
        tm = rows
    else:
        tm = max(sublane_mult, (tm_cap // sublane_mult) * sublane_mult)
    return tm, tl


def _global_max_pool_rows_kernel(x_ref, o_ref, *, length, tl, single_k):
    """x_ref: (TM, TL) input tile; o_ref: (TM, 1) resident accumulator/output."""
    x = x_ref[...]
    lo = _min_value(x_ref.dtype)

    if length % tl != 0:
        # Mask lanes past the true length in the ragged last L block so padding
        # never participates in the max.
        col = jax.lax.broadcasted_iota(jnp.int32, x.shape, 1) + pl.program_id(1) * tl
        x = jnp.where(col < length, x, lo)

    tile_max = jnp.max(x, axis=-1, keepdims=True)

    if single_k:
        # No reduction grid axis: write directly, no accumulator round-trip.
        o_ref[...] = tile_max
    else:
        @pl.when(pl.program_id(1) == 0)
        def _():
            o_ref[...] = jnp.full(o_ref.shape, lo, dtype=o_ref.dtype)

        o_ref[...] = jnp.maximum(o_ref[...], tile_max)


def global_max_pool1d(x: jax.Array) -> jax.Array:
    """Matches F.max_pool1d(x, kernel_size=x.shape[2]) on an (N, C, L) tensor."""
    n, c, l = x.shape
    rows = n * c
    x2d = x.reshape(rows, l)  # free: row-major contiguous view of (N, C, L)

    tm, tl = _choose_tiles(rows, l, x.dtype.itemsize)
    grid = (pl.cdiv(rows, tm), pl.cdiv(l, tl))

    kernel = functools.partial(
        _global_max_pool_rows_kernel, length=l, tl=tl, single_k=(grid[1] == 1))

    out2d = pl.pallas_call(
        kernel,
        out_shape=jax.ShapeDtypeStruct((rows, 1), x.dtype),
        grid_spec=pltpu.PrefetchScalarGridSpec(
            num_scalar_prefetch=0,
            grid=grid,
            in_specs=[pl.BlockSpec((tm, tl), lambda i, k: (i, k))],
            # Constant along k -> resident accumulator across the reduction axis.
            out_specs=pl.BlockSpec((tm, 1), lambda i, k: (i, 0)),
        ),
        compiler_params=pltpu.CompilerParams(
            dimension_semantics=("parallel", "arbitrary"),
        ),
    )(x2d)

    return out2d.reshape(n, c, 1)


if __name__ == "__main__":
    key = jax.random.PRNGKey(0)
    # Small NCL input consistent with the module's forward (batch, channels, length).
    x = jax.random.normal(key, (2, 4, 16), dtype=jnp.float32)

    out = global_max_pool1d(x)
    out = jax.block_until_ready(out)

    # Reference check (same semantics as F.max_pool1d with full-width kernel).
    ref = jnp.max(x, axis=2, keepdims=True)
    assert out.shape == (2, 4, 1), out.shape
    assert out.dtype == x.dtype, out.dtype
    assert jnp.allclose(out, ref), "mismatch vs reference"

    print("KERNEL_OK")
</pallas_src>

<mosaic_0001>
module attributes {stable_mosaic.version = 11 : i64} {
  func.func @_global_max_pool_rows_kernel(%arg0: i32, %arg1: i32, %arg2: memref<8x16xf32, #tpu.memory_space<vmem>>, %arg3: memref<8x1xf32, #tpu.memory_space<vmem>>) attributes {dimension_semantics = [#tpu.dimension_semantics<parallel>, #tpu.dimension_semantics<arbitrary>], iteration_bounds = array<i64: 1, 1>, scalar_prefetch = 0 : i64, scratch_operands = 0 : i64, tpu.core_type = #tpu.core_type<tc>, window_params = [{transform_indices = @transform_0, window_bounds = array<i64: 8, 16>}, {transform_indices = @transform_1, window_bounds = array<i64: 8, 1>}]} {
    %c0 = arith.constant 0 : index
    %c0_0 = arith.constant 0 : index
    %0 = vector.load %arg2[%c0, %c0_0] : memref<8x16xf32, #tpu.memory_space<vmem>>, vector<8x16xf32>
    %cst = arith.constant dense<0xFF800000> : vector<8xf32>
    %1 = vector.multi_reduction <maximumf>, %0, %cst [1] : vector<8x16xf32> to vector<8xf32>
    %2 = vector.shape_cast %1 : vector<8xf32> to vector<8x1xf32>
    %c0_1 = arith.constant 0 : index
    %c0_2 = arith.constant 0 : index
    %3 = vector.load %arg3[%c0_1, %c0_2] : memref<8x1xf32, #tpu.memory_space<vmem>>, vector<8x1xf32>
    tpu.vector_store %arg3[%c0_1, %c0_2], %2 {strides = array<i32>} : memref<8x1xf32, #tpu.memory_space<vmem>>, vector<8x1xf32>,
    return
  }
  func.func @transform_0(%arg0: i32, %arg1: i32) -> (i32, i32) {
    %c0_i32 = arith.constant 0 : i32
    return %arg0, %arg1 : i32, i32
  }
  func.func @transform_1(%arg0: i32, %arg1: i32) -> (i32, i32) {
    %c0_i32 = arith.constant 0 : i32
    %c0_i32_0 = arith.constant 0 : i32
    return %arg0, %c0_i32 : i32, i32
  }
}

</mosaic_0001>

<bundles_post_ra>
// kernel: tpu_custom_call.1
= control target key start
LH: loop header
LB: loop body
LE: loop exit
PB: predicated region body
PF: predicated region fallthrough
CT: control target
= control target key end

     0   :  { %6 = vsyncpa [#allocation3], 0  ;;  %s57_s6 = smov [#allocation2]   ;;  %s83_s0 = inlined_call_operand.hbm [shape: f32[8,16], index: 0, kind: input, shape index: {}]   ;;  %s84_s1 = inlined_call_operand.vmem [shape: f32[8,1], index: 1, kind: output, shape index: {}]  }
   0x1   :  { %s13_s7 = sshll.u32 %s57_s6, 4  ;;  %s33_s10 = scalar_lea.hbm %s83_s0, 128  ;;  %s14_s7 = int_to_ptr.vmem [resolvable:$true] %s13_s7 }
   0x2   :  { %p34_p0 = scmp.ne.s32.totalorder %s83_s0, %s33_s10  ;;  %p37_p1 = scmp.lt.u32.totalorder %s33_s10, %s83_s0 }
   0x4   :  { %p39_p2 = pnand %p37_p1, %p34_p0 }
   0x6   :  { %42 = shalt.err (!%p39_p2)
}
   0x7   :  { %s43_s15 = scalar_lea.vmem %s14_s7, 128  ;;  %p48_p4 = scmp.lt.s32.totalorder %s14_s7, %s14_s7 }
   0x8   :  { %p44_p3 = scmp.ne.s32.totalorder %s14_s7, %s43_s15  ;;  %p49_p5 = scmp.lt.s32.totalorder %s43_s15, %s43_s15 }
   0xa   :  { %p50_p6 = por %p49_p5, %p48_p4 }
   0xc   :  { %p51_p7 = pnand %p50_p6, %p44_p3 }
   0xe   :  { %54 = shalt.err (!%p51_p7)
}
   0xf   :  { %16 = dma.hbm_to_vmem [thread:$0]  %s83_s0, 128, %s14_s7, [#allocation3]  }
  0x10   :  { %55 = dma.done.wait [#allocation3], 128  }
  0x11   :  { %56 = vsyncadd [#allocation3], 4294967168  ;;  %vm21_vm0 = vcmask 130048   ;;  %v20_v0 = vld [vmem:[#allocation2] sm:$0xff]  ;;  %vm25_vm1 = vcmask 7168  }
  0x12   :  { %v22_v1 = vsel %vm21_vm0, %v20_v0, -inf }
  0x13   :  { %23 = vmax.xlane.f32.xlu0 %v22_v1 }
  0xa0   :  { %v24_v2 = vpop.xlane.xlu0 %23 }
  0xa1   :  { %26 = vst.msk [vmem:[%s84_s1] sm:$0xff] %vm25_vm1, %v24_v2 }
  0xa2   :  { %31 = vsyncpa [#allocation3], 1 }

</bundles_post_ra>
